<compile_context>
chip_gen: v6e
topology: v6e:2x2x1
jax: 0.10.0
libtpu: 0.0.40
codegen_flags: <defaults>
</compile_context>

<pallas_src>
import functools

import jax
import jax.numpy as jnp
from jax.experimental import pallas as pl
from jax.experimental.pallas import tpu as pltpu

_LANES = 7 * 128  # 896: slab width; multiple of both 7 and 128.


def _cdiv(a, b):
    return (a + b - 1) // b


def _round_up(x, m):
    return ((x + m - 1) // m) * m


def dynamic_loss_kernel(params_ref, mask_ref, pred_ref, targ_ref, out_ref,
                        acc_ref, *, n_rows):
    # params_ref: SMEM (2,) f32   -> [sx, sq]            (scalar prefetch)
    # mask_ref:   VMEM (1, 896) f32, 1.0 where lane % 7 < 3 (translation lanes)
    # pred_ref/targ_ref: VMEM (TR, 896) tiles of the flattened pose slabs
    # out_ref:    SMEM (1, 1) f32 scalar output (resident across the grid)
    # acc_ref:    VMEM (1, 896) f32 persistent per-lane accumulator
    i = pl.program_id(0)

    @pl.when(i == 0)
    def _init():
        acc_ref[...] = jnp.zeros_like(acc_ref)

    p = pred_ref[...].astype(jnp.float32)
    t = targ_ref[...].astype(jnp.float32)
    d = p - t
    # Fold this tile's rows into the small per-lane accumulator (VPU adds plus
    # one sublane reduce; fully hidden under the HBM-bound input DMAs).
    acc_ref[...] += jnp.sum(d * d, axis=0, keepdims=True)

    @pl.when(i == pl.num_programs(0) - 1)
    def _finalize():
        acc = acc_ref[...]                    # (1, 896)
        m = mask_ref[...]                     # (1, 896)
        total = jnp.sum(acc)
        sum_x = jnp.sum(acc * m)              # translation lanes
        sum_q = total - sum_x                 # quaternion lanes
        mse_x = sum_x / jnp.float32(n_rows * 3)
        mse_q = sum_q / jnp.float32(n_rows * 4)
        sx = params_ref[0]
        sq = params_ref[1]
        out_ref[0, 0] = (jnp.exp(-sx) * mse_x + sx
                         + jnp.exp(-sq) * mse_q + sq)


def dynamic_loss(pred, targ, sx=0.0, sq=-3.0, *, tile_rows=1536):
    """Pallas-backed DynamicLoss forward. pred/targ: (N, 7)."""
    n, c = pred.shape
    assert c == 7, "expected N x 7 pose tensors (3 translation + 4 quaternion)"
    assert targ.shape == pred.shape
    assert pred.dtype == targ.dtype, "pred/targ dtypes must match"
    assert n >= 1

    total = n * 7
    rows = _cdiv(total, _LANES)
    # Pick tile rows: multiple of 16 (full bf16 sublane packing), evenly
    # dividing the padded slab, and no larger than needed (padding < 16 rows
    # per tile).  Default tile_rows=1536 -> <= 5.25 MiB f32 per input tile.
    num_tiles = max(1, _cdiv(rows, max(1, tile_rows)))
    tr = _round_up(_cdiv(rows, num_tiles), 16)
    rows_pad = num_tiles * tr
    padded_len = rows_pad * _LANES

    def prep(x):
        flat = jnp.ravel(x)                              # (7N,) row-major
        flat = jnp.pad(flat, (0, padded_len - total))    # zero padded tail
        return jnp.reshape(flat, (rows_pad, _LANES))

    pred_slab = prep(pred)   # native dtype (bf16 stays bf16; cast in-kernel)
    targ_slab = prep(targ)

    # Since 896 % 7 == 0, flat index % 7 == lane column % 7 for every row.
    lane_mod7 = jnp.arange(_LANES, dtype=jnp.int32) % 7
    mask = (lane_mod7 < 3).astype(jnp.float32).reshape(1, _LANES)

    params = jnp.array([sx, sq], dtype=jnp.float32)
    kernel = functools.partial(dynamic_loss_kernel, n_rows=n)

    out = pl.pallas_call(
        kernel,
        out_shape=jax.ShapeDtypeStruct((1, 1), jnp.float32),
        grid_spec=pltpu.PrefetchScalarGridSpec(
            num_scalar_prefetch=1,
            grid=(num_tiles,),
            in_specs=[
                pl.BlockSpec((1, _LANES), lambda i, params: (0, 0)),
                pl.BlockSpec((tr, _LANES), lambda i, params: (i, 0)),
                pl.BlockSpec((tr, _LANES), lambda i, params: (i, 0)),
            ],
            out_specs=pl.BlockSpec(memory_space=pltpu.SMEM),
            scratch_shapes=[pltpu.VMEM((1, _LANES), jnp.float32)],
        ),
        compiler_params=pltpu.CompilerParams(
            dimension_semantics=("arbitrary",),
            vmem_limit_bytes=32 * 1024 * 1024,
        ),
    )(params, mask, pred_slab, targ_slab)
    return out[0, 0]


def dynamic_loss_ref(pred, targ, sx=0.0, sq=-3.0):
    """Pure-JAX reference mirroring the PyTorch module."""
    pred = pred.astype(jnp.float32)
    targ = targ.astype(jnp.float32)
    mse_x = jnp.mean((pred[:, :3] - targ[:, :3]) ** 2)
    mse_q = jnp.mean((pred[:, 3:] - targ[:, 3:]) ** 2)
    return jnp.exp(-sx) * mse_x + sx + jnp.exp(-sq) * mse_q + sq


if __name__ == "__main__":
    key = jax.random.PRNGKey(0)
    k1, k2, k3, k4, k5, k6 = jax.random.split(key, 6)

    # Small batch of pose predictions (N x 7), default (large) tile -> 1 step.
    N = 8
    pred = jax.random.normal(k1, (N, 7), dtype=jnp.float32)
    targ = jax.random.normal(k2, (N, 7), dtype=jnp.float32)
    out = jax.block_until_ready(dynamic_loss(pred, targ, sx=0.0, sq=-3.0))
    ref = jax.block_until_ready(dynamic_loss_ref(pred, targ, sx=0.0, sq=-3.0))
    assert jnp.allclose(out, ref, rtol=1e-5, atol=1e-5), (out, ref)

    # Multi-tile gridded path (small tile so the grid has >1 step) plus a
    # zero-padded ragged tail of the flattened slab.
    N2 = 3000
    pred2 = jax.random.normal(k3, (N2, 7), dtype=jnp.float32)
    targ2 = jax.random.normal(k4, (N2, 7), dtype=jnp.float32)
    out2 = jax.block_until_ready(
        dynamic_loss(pred2, targ2, sx=0.5, sq=-2.0, tile_rows=16))
    ref2 = jax.block_until_ready(dynamic_loss_ref(pred2, targ2, sx=0.5, sq=-2.0))
    assert jnp.allclose(out2, ref2, rtol=1e-5, atol=1e-5), (out2, ref2)

    # bf16 inputs stream natively (tile rows are a multiple of 16 so packed
    # (16,128) bf16 vregs are full); accumulation stays f32.
    N3 = 300
    pred3 = jax.random.normal(k5, (N3, 7), dtype=jnp.float32).astype(jnp.bfloat16)
    targ3 = jax.random.normal(k6, (N3, 7), dtype=jnp.float32).astype(jnp.bfloat16)
    out3 = jax.block_until_ready(dynamic_loss(pred3, targ3, sx=0.0, sq=-3.0))
    ref3 = jax.block_until_ready(dynamic_loss_ref(pred3, targ3, sx=0.0, sq=-3.0))
    assert jnp.allclose(out3, ref3, rtol=1e-4, atol=1e-4), (out3, ref3)

    print("KERNEL_OK")
</pallas_src>

<mosaic_0001>
module attributes {stable_mosaic.version = 11 : i64} {
  func.func @dynamic_loss_kernel(%arg0: i32, %arg1: memref<2xf32, #tpu.memory_space<smem>>, %arg2: memref<1x896xf32, #tpu.memory_space<vmem>>, %arg3: memref<16x896xf32, #tpu.memory_space<vmem>>, %arg4: memref<16x896xf32, #tpu.memory_space<vmem>>, %arg5: memref<1x1xf32, #tpu.memory_space<smem>>, %arg6: memref<1x896xf32, #tpu.memory_space<vmem>>) attributes {dimension_semantics = [#tpu.dimension_semantics<arbitrary>], iteration_bounds = array<i64: 1>, scalar_prefetch = 1 : i64, scratch_operands = 1 : i64, tpu.core_type = #tpu.core_type<tc>, window_params = [{pipeline_mode = #tpu.pipeline_mode<synchronous>, transform_indices = @transform_0, window_bounds = array<i64: 1, 896>}, {transform_indices = @transform_1, window_bounds = array<i64: 16, 896>}, {transform_indices = @transform_2, window_bounds = array<i64: 16, 896>}, {transform_indices = @transform_3, window_bounds = array<i64: 1, 1>}]} {
    %c0_i32 = arith.constant 0 : i32
    %0 = arith.cmpi eq, %arg0, %c0_i32 : i32
    %1 = arith.extui %0 : i1 to i32
    %c0_i32_0 = arith.constant 0 : i32
    %2 = arith.cmpi ne, %1, %c0_i32_0 : i32
    scf.if %2 {
      %cst_10 = arith.constant 0.000000e+00 : f32
      %15 = vector.broadcast %cst_10 : f32 to vector<1x896xf32>
      %c0_11 = arith.constant 0 : index
      %c0_12 = arith.constant 0 : index
      %16 = vector.load %arg6[%c0_11, %c0_12] : memref<1x896xf32, #tpu.memory_space<vmem>>, vector<1x896xf32>
      tpu.vector_store %arg6[%c0_11, %c0_12], %15 {strides = array<i32>} : memref<1x896xf32, #tpu.memory_space<vmem>>, vector<1x896xf32>,
    } else {
    }
    %c0 = arith.constant 0 : index
    %c0_1 = arith.constant 0 : index
    %3 = vector.load %arg3[%c0, %c0_1] : memref<16x896xf32, #tpu.memory_space<vmem>>, vector<16x896xf32>
    %c0_2 = arith.constant 0 : index
    %c0_3 = arith.constant 0 : index
    %4 = vector.load %arg4[%c0_2, %c0_3] : memref<16x896xf32, #tpu.memory_space<vmem>>, vector<16x896xf32>
    %5 = arith.subf %3, %4 : vector<16x896xf32>
    %c0_4 = arith.constant 0 : index
    %c0_5 = arith.constant 0 : index
    %6 = vector.load %arg6[%c0_4, %c0_5] : memref<1x896xf32, #tpu.memory_space<vmem>>, vector<1x896xf32>
    %7 = arith.mulf %5, %5 : vector<16x896xf32>
    %cst = arith.constant dense<0.000000e+00> : vector<896xf32>
    %8 = vector.multi_reduction <add>, %7, %cst [0] : vector<16x896xf32> to vector<896xf32>
    %9 = vector.shape_cast %8 : vector<896xf32> to vector<1x896xf32>
    %10 = arith.addf %6, %9 : vector<1x896xf32>
    %c0_6 = arith.constant 0 : index
    %c0_7 = arith.constant 0 : index
    %11 = vector.load %arg6[%c0_6, %c0_7] : memref<1x896xf32, #tpu.memory_space<vmem>>, vector<1x896xf32>
    tpu.vector_store %arg6[%c0_6, %c0_7], %10 {strides = array<i32>} : memref<1x896xf32, #tpu.memory_space<vmem>>, vector<1x896xf32>,
    %c0_i32_8 = arith.constant 0 : i32
    %12 = arith.cmpi eq, %arg0, %c0_i32_8 : i32
    %13 = arith.extui %12 : i1 to i32
    %c0_i32_9 = arith.constant 0 : i32
    %14 = arith.cmpi ne, %13, %c0_i32_9 : i32
    scf.if %14 {
      %c0_10 = arith.constant 0 : index
      %c0_11 = arith.constant 0 : index
      %15 = vector.load %arg6[%c0_10, %c0_11] : memref<1x896xf32, #tpu.memory_space<vmem>>, vector<1x896xf32>
      %c0_12 = arith.constant 0 : index
      %c0_13 = arith.constant 0 : index
      %16 = vector.load %arg2[%c0_12, %c0_13] : memref<1x896xf32, #tpu.memory_space<vmem>>, vector<1x896xf32>
      %17 = vector.shape_cast %15 : vector<1x896xf32> to vector<1x1x896xf32>
      %cst_14 = arith.constant dense<0.000000e+00> : vector<1xf32>
      %18 = vector.multi_reduction <add>, %17, %cst_14 [1, 2] : vector<1x1x896xf32> to vector<1xf32>
      %19 = vector.shape_cast %18 : vector<1xf32> to vector<1x1x1xf32>
      %20 = vector.extract %19[0, 0, 0] : f32 from vector<1x1x1xf32>
      %21 = arith.mulf %15, %16 : vector<1x896xf32>
      %22 = vector.shape_cast %21 : vector<1x896xf32> to vector<1x1x896xf32>
      %cst_15 = arith.constant dense<0.000000e+00> : vector<1xf32>
      %23 = vector.multi_reduction <add>, %22, %cst_15 [1, 2] : vector<1x1x896xf32> to vector<1xf32>
      %24 = vector.shape_cast %23 : vector<1xf32> to vector<1x1x1xf32>
      %25 = vector.extract %24[0, 0, 0] : f32 from vector<1x1x1xf32>
      %26 = arith.subf %20, %25 : f32
      %cst_16 = arith.constant 2.400000e+01 : f32
      %27 = arith.divf %25, %cst_16 : f32
      %cst_17 = arith.constant 3.200000e+01 : f32
      %28 = arith.divf %26, %cst_17 : f32
      %c0_18 = arith.constant 0 : index
      %29 = memref.load %arg1[%c0_18] : memref<2xf32, #tpu.memory_space<smem>>
      %c1 = arith.constant 1 : index
      %30 = memref.load %arg1[%c1] : memref<2xf32, #tpu.memory_space<smem>>
      %cst_19 = arith.constant 0.000000e+00 : f32
      %31 = arith.subf %cst_19, %29 : f32
      %32 = math.exp %31 : f32
      %33 = arith.mulf %32, %27 : f32
      %34 = arith.addf %33, %29 : f32
      %cst_20 = arith.constant 0.000000e+00 : f32
      %35 = arith.subf %cst_20, %30 : f32
      %36 = math.exp %35 : f32
      %37 = arith.mulf %36, %28 : f32
      %38 = arith.addf %34, %37 : f32
      %39 = arith.addf %38, %30 : f32
      %c0_21 = arith.constant 0 : index
      %c0_22 = arith.constant 0 : index
      %40 = memref.load %arg5[%c0_21, %c0_22] : memref<1x1xf32, #tpu.memory_space<smem>>
      memref.store %39, %arg5[%c0_21, %c0_22] : memref<1x1xf32, #tpu.memory_space<smem>>
    } else {
    }
    return
  }
  func.func @transform_0(%arg0: i32, %arg1: memref<2xf32, #tpu.memory_space<smem>>) -> (i32, i32) {
    %c0_i32 = arith.constant 0 : i32
    %c0_i32_0 = arith.constant 0 : i32
    %c0_i32_1 = arith.constant 0 : i32
    return %c0_i32, %c0_i32_0 : i32, i32
  }
  func.func @transform_1(%arg0: i32, %arg1: memref<2xf32, #tpu.memory_space<smem>>) -> (i32, i32) {
    %c0_i32 = arith.constant 0 : i32
    %c0_i32_0 = arith.constant 0 : i32
    return %arg0, %c0_i32 : i32, i32
  }
  func.func @transform_2(%arg0: i32, %arg1: memref<2xf32, #tpu.memory_space<smem>>) -> (i32, i32) {
    %c0_i32 = arith.constant 0 : i32
    %c0_i32_0 = arith.constant 0 : i32
    return %arg0, %c0_i32 : i32, i32
  }
  func.func @transform_3(%arg0: i32, %arg1: memref<2xf32, #tpu.memory_space<smem>>) -> (i32, i32) {
    %c0_i32 = arith.constant 0 : i32
    %c0_i32_0 = arith.constant 0 : i32
    %c0_i32_1 = arith.constant 0 : i32
    return %c0_i32, %c0_i32_0 : i32, i32
  }
}

</mosaic_0001>

<bundles_post_ra>
// kernel: tpu_custom_call.1
= control target key start
LH: loop header
LB: loop body
LE: loop exit
PB: predicated region body
PF: predicated region fallthrough
CT: control target
= control target key end

     0   :  { %s506_s15 = smov [#allocation4]   ;;  %s597_s0 = inlined_call_operand.hbm [shape: f32[2], index: 0, kind: input, shape index: {}]   ;;  %s598_s1 = inlined_call_operand.hbm [shape: f32[1,896], index: 1, kind: input, shape index: {}]   ;;  %s599_s2 = inlined_call_operand.hbm [shape: f32[16,896], index: 2, kind: input, shape index: {}]   ;;  %s600_s3 = inlined_call_operand.hbm [shape: f32[16,896], index: 3, kind: input, shape index: {}]   ;;  %s601_s4 = inlined_call_operand.hbm [shape: f32[1,1], index: 4, kind: output, shape index: {}]  }
   0x1   :  { %10 = dma.hbm_to_smem %s597_s0, 16, %s506_s15, [#allocation3] }
   0x2   :  { %498 = dma.done.wait [#allocation3], 16 }
   0x3   :  { %499 = vsyncadd [#allocation3], 4294967280 }
   0x4   :  { %12 = sfence }
   0x5   :  { %13 = vsyncpa [#allocation6], 0 }
   0x6   :  { %14 = vsyncpa [#allocation9], 0 }
   0x7   :  { %15 = vsyncpa [#allocation7], 0  ;;  %s507_s18 = smov [#allocation8]  }
   0x8   :  { %s31_s19 = sshll.u32 %s507_s18, 4  ;;  %s32_s19 = int_to_ptr.vmem [resolvable:$true] %s31_s19 }
   0x9   :  { %s438_s20 = scalar_lea.vmem %s32_s19, 1792  ;;  %p443_p1 = scmp.lt.s32.totalorder %s32_s19, %s32_s19 }
   0xa   :  { %p439_p0 = scmp.ne.s32.totalorder %s32_s19, %s438_s20  ;;  %p444_p2 = scmp.lt.s32.totalorder %s438_s20, %s438_s20 }
   0xc   :  { %p445_p3 = por %p444_p2, %p443_p1 }
   0xe   :  { %p446_p4 = pnand %p445_p3, %p439_p0 }
  0x10   :  { %449 = shalt.err (!%p446_p4)
}
  0x11   :  { %s508_s21 = smov 896   ;;  %s509_s22 = smov 56  }
  0x12   :  { %37 = dma.hbm_to_vmem [thread:$0]  %s599_s2, 1792, %s32_s19, [#allocation9], %s508_s21, %s508_s21, %s509_s22  }
  0x13   :  { %s510_s24 = smov [#allocation5]   ;;  %s511_s26 = smov [#allocation10]  }
  0x14   :  { %s22_s25 = sshll.u32 %s510_s24, 4  ;;  %s43_s27 = sshll.u32 %s511_s26, 4  ;;  %s23_s25 = int_to_ptr.vmem [resolvable:$true] %s22_s25  ;;  %s44_s27 = int_to_ptr.vmem [resolvable:$true] %s43_s27 }
  0x15   :  { %s458_s28 = scalar_lea.vmem %s23_s25, 112  ;;  %s462_s29 = scalar_lea.vmem %s23_s25, 128 }
  0x16   :  { %p459_p5 = scmp.ne.s32.totalorder %s23_s25, %s458_s28  ;;  %p463_p6 = scmp.lt.s32.totalorder %s23_s25, %s23_s25 }
  0x17   :  { %p464_p7 = scmp.lt.s32.totalorder %s462_s29, %s458_s28 }
  0x19   :  { %p465_p8 = por %p464_p7, %p463_p6 }
  0x1b   :  { %p466_p9 = pnand %p465_p8, %p459_p5 }
  0x1d   :  { %469 = shalt.err (!%p466_p9)
}
  0x1e   :  { %25 = dma.hbm_to_vmem [thread:$0]  %s598_s1, 112, %s23_s25, [#allocation6]  }
  0x1f   :  { %s478_s6 = scalar_lea.vmem %s44_s27, 1792  ;;  %p483_p11 = scmp.lt.s32.totalorder %s44_s27, %s44_s27 }
  0x20   :  { %p479_p10 = scmp.ne.s32.totalorder %s44_s27, %s478_s6  ;;  %p484_p12 = scmp.lt.s32.totalorder %s478_s6, %s478_s6 }
  0x22   :  { %p485_p13 = por %p484_p12, %p483_p11 }
  0x24   :  { %p486_p0 = pnand %p485_p13, %p479_p10 }
  0x26   :  { %489 = shalt.err (!%p486_p0)
}
  0x27   :  { %49 = dma.hbm_to_vmem [thread:$0]  %s600_s3, 1792, %s44_s27, [#allocation9], %s508_s21, %s508_s21, %s509_s22  }
  0x28   :  { %500 = dma.done.wait [#allocation6], 112  }
  0x29   :  { %501 = vsyncadd [#allocation6], 4294967184 }
  0x2a   :  { %502 = dma.done.wait [#allocation9], 3584  }
  0x2b   :  { %503 = vsyncadd [#allocation9], 4294963712  ;;  %v63_v0 = vlaneseq  ;;  %v512_v2 = vmov 0.0   ;;  %v68_v3 = vld [vmem:[#allocation8] sm:$0xff]  ;;  %v69_v4 = vld [vmem:[#allocation8 + $0x8] sm:$0xff]  ;;  %vm277_vm1 = vcmask 1040384  }
  0x2c   :  { %v70_v5 = vld [vmem:[#allocation8 + $0x10] sm:$0xff]  ;;  %v71_v6 = vld [vmem:[#allocation8 + $0x18] sm:$0xff]  ;;  %v72_v7 = vld [vmem:[#allocation8 + $0x20] sm:$0xff]  ;;  %s586_s1 = sld [smem:[#allocation4]]  ;;  %s514_s22 = smov [#allocation11]  }
  0x2d   :  { %vm553_vm0 = vcmp.lt.s32.totalorder %v63_v0, 896  ;;  %v73_v8 = vld [vmem:[#allocation8 + $0x28] sm:$0xff]  ;;  %v74_v9 = vld [vmem:[#allocation8 + $0x30] sm:$0xff]  ;;  %v75_v10 = vld [vmem:[#allocation8 + $0x38] sm:$0xff]  ;;  %s588_s3 = sld [smem:[#allocation4 + $0x1]] }
  0x2e   :  { %67 = vst.msk [vmem:[#allocation2] sm:$0x7f] %vm553_vm0, %v512_v2  ;;  %v76_v11 = vld [vmem:[#allocation8 + $0x40] sm:$0xff]  ;;  %v77_v12 = vld [vmem:[#allocation8 + $0x48] sm:$0xff]  ;;  %v78_v13 = vld [vmem:[#allocation8 + $0x50] sm:$0xff] }
  0x2f   :  { %v79_v14 = vld [vmem:[#allocation8 + $0x58] sm:$0xff]  ;;  %v80_v15 = vld [vmem:[#allocation8 + $0x60] sm:$0xff]  ;;  %v82_v16 = vld [vmem:[#allocation10] sm:$0xff] }
  0x30   :  { %v81_v17 = vld [vmem:[#allocation8 + $0x68] sm:$0xff]  ;;  %v83_v18 = vld [vmem:[#allocation10 + $0x8] sm:$0xff]  ;;  %v84_v19 = vld [vmem:[#allocation10 + $0x10] sm:$0xff]  ;;  %v96_v21 = vsub.f32 %v68_v3, %v82_v16  ;;  %v560_v16 = vshrl.u32 %v63_v0, 7 }
  0x31   :  { %v85_v20 = vld [vmem:[#allocation10 + $0x18] sm:$0xff]  ;;  %v86_v22 = vld [vmem:[#allocation10 + $0x20] sm:$0xff]  ;;  %v87_v23 = vld [vmem:[#allocation10 + $0x28] sm:$0xff]  ;;  %v97_v25 = vsub.f32 %v69_v4, %v83_v18  ;;  %v98_v26 = vsub.f32 %v70_v5, %v84_v19 }
  0x32   :  { %v88_v24 = vld [vmem:[#allocation10 + $0x30] sm:$0xff]  ;;  %v99_v27 = vsub.f32 %v71_v6, %v85_v20  ;;  %v89_v28 = vld [vmem:[#allocation10 + $0x38] sm:$0xff]  ;;  %v90_v29 = vld [vmem:[#allocation10 + $0x40] sm:$0xff]  ;;  %v100_v31 = vsub.f32 %v72_v7, %v86_v22  ;;  %v101_v32 = vsub.f32 %v73_v8, %v87_v23  ;;  %v111_v34 = vmul.f32 %v96_v21, %v96_v21  ;;  %s368_s8 = ssub.f32 0.0, %s586_s1 }
  0x33   :  { %v91_v30 = vld [vmem:[#allocation10 + $0x48] sm:$0xff]  ;;  %v102_v33 = vsub.f32 %v74_v9, %v88_v24  ;;  %v92_v35 = vld [vmem:[#allocation10 + $0x50] sm:$0xff]  ;;  %v93_v36 = vld [vmem:[#allocation10 + $0x58] sm:$0xff]  ;;  %v103_v38 = vsub.f32 %v75_v10, %v89_v28  ;;  %v104_v39 = vsub.f32 %v76_v11, %v90_v29  ;;  %v112_v41 = vmul.f32 %v97_v25, %v97_v25  ;;  %s375_s9 = ssub.f32 0.0, %s588_s3 }
  0x34   :  { %v94_v37 = vld [vmem:[#allocation10 + $0x60] sm:$0xff]  ;;  %v105_v40 = vsub.f32 %v77_v12, %v91_v30  ;;  %v95_v42 = vld [vmem:[#allocation10 + $0x68] sm:$0xff]  ;;  %v106_v43 = vsub.f32 %v78_v13, %v92_v35  ;;  %v107_v44 = vsub.f32 %v79_v14, %v93_v36  ;;  %v113_v46 = vmul.f32 %v98_v26, %v98_v26 }
  0x35   :  { %v108_v45 = vsub.f32 %v80_v15, %v94_v37  ;;  %v109_v47 = vsub.f32 %v81_v17, %v95_v42  ;;  %v114_v48 = vmul.f32 %v99_v27, %v99_v27  ;;  %v115_v49 = vmul.f32 %v100_v31, %v100_v31 }
  0x36   :  { %v116_v50 = vmul.f32 %v101_v32, %v101_v32  ;;  %v117_v51 = vmul.f32 %v102_v33, %v102_v33  ;;  %v118_v52 = vmul.f32 %v103_v38, %v103_v38  ;;  %v119_v53 = vmul.f32 %v104_v39, %v104_v39 }
  0x37   :  { %v120_v54 = vmul.f32 %v105_v40, %v105_v40  ;;  %v121_v55 = vmul.f32 %v106_v43, %v106_v43  ;;  %v122_v56 = vmul.f32 %v107_v44, %v107_v44  ;;  %v123_v57 = vmul.f32 %v108_v45, %v108_v45 }
  0x38   :  { %v124_v58 = vmul.f32 %v109_v47, %v109_v47  ;;  %v125_v59 = vadd.f32 %v118_v52, %v111_v34  ;;  %v132_v60 = vadd.f32 %v119_v53, %v112_v41  ;;  %v513_v7 = vmov 1966171168  }
  0x39   :  { %v139_v61 = vadd.f32 %v120_v54, %v113_v46  ;;  %v146_v62 = vadd.f32 %v121_v55, %v114_v48  ;;  %v153_v63 = vadd.f32 %v122_v56, %v115_v49  ;;  %v160_v2 = vadd.f32 %v123_v57, %v116_v50 }
  0x3a   :  { %v167_v3 = vadd.f32 %v124_v58, %v117_v51  ;;  %v126_v4 = vrot.slane %v125_v59, 4  ;;  %v133_v5 = vrot.slane %v132_v60, 4  ;;  %v185_v8 = vunpack.c.l.s4 %v513_v7  ;;  %v240_v7 = vld [vmem:[#allocation5] sm:$0xff] }
  0x3b   :  { %v140_v6 = vrot.slane %v139_v61, 4  ;;  %v147_v9 = vrot.slane %v146_v62, 4  ;;  %v154_v10 = vrot.slane %v153_v63, 4  ;;  %v161_v11 = vrot.slane %v160_v2, 4 }
  0x3c   :  { %v168_v12 = vrot.slane %v167_v3, 4  ;;  %v127_v13 = vadd.f32 %v126_v4, %v125_v59  ;;  %v134_v14 = vadd.f32 %v133_v5, %v132_v60  ;;  %v186_v24 = vunpack.c.0.s8 %v185_v8 }
  0x3d   :  { %v141_v15 = vadd.f32 %v140_v6, %v139_v61  ;;  %v148_v17 = vadd.f32 %v147_v9, %v146_v62  ;;  %v155_v18 = vadd.f32 %v154_v10, %v153_v63  ;;  %v162_v19 = vadd.f32 %v161_v11, %v160_v2  ;;  %v110_v61 = vld [vmem:[#allocation2] sm:$0xff] }
  0x3e   :  { %v169_v20 = vadd.f32 %v168_v12, %v167_v3  ;;  %v128_v21 = vrot.slane %v127_v13, 2  ;;  %v135_v22 = vrot.slane %v134_v14, 2  ;;  %v189_v38 = vsub.s32 %v186_v24, %v560_v16 }
  0x3f   :  { %v142_v23 = vrot.slane %v141_v15, 2  ;;  %v149_v25 = vrot.slane %v148_v17, 2  ;;  %v156_v26 = vrot.slane %v155_v18, 2  ;;  %v163_v27 = vrot.slane %v162_v19, 2 }
  0x40   :  { %v170_v28 = vrot.slane %v169_v20, 2  ;;  %v129_v29 = vadd.f32 %v128_v21, %v127_v13  ;;  %v136_v30 = vadd.f32 %v135_v22, %v134_v14  ;;  %v244_v2 = vsub.s32 0, %v560_v16 }
  0x41   :  { %v143_v31 = vadd.f32 %v142_v23, %v141_v15  ;;  %v150_v32 = vadd.f32 %v149_v25, %v148_v17  ;;  %v157_v33 = vadd.f32 %v156_v26, %v155_v18  ;;  %v164_v34 = vadd.f32 %v163_v27, %v162_v19 }
  0x42   :  { %v171_v0 = vadd.f32 %v170_v28, %v169_v20  ;;  %v130_v35 = vrot.slane %v129_v29, 1  ;;  %v137_v36 = vrot.slane %v136_v30, 1  ;;  %v248_v3 = vsub.s32 1, %v560_v16 }
  0x43   :  { %v144_v37 = vrot.slane %v143_v31, 1  ;;  %v151_v39 = vrot.slane %v150_v32, 1  ;;  %v158_v40 = vrot.slane %v157_v33, 1  ;;  %v165_v41 = vrot.slane %v164_v34, 1 }
  0x44   :  { %v172_v42 = vrot.slane %v171_v0, 1  ;;  %v131_v43 = vadd.f32 %v130_v35, %v129_v29  ;;  %v138_v44 = vadd.f32 %v137_v36, %v136_v30  ;;  %v252_v4 = vsub.s32 2, %v560_v16 }
  0x45   :  { %v145_v45 = vadd.f32 %v144_v37, %v143_v31  ;;  %v152_v46 = vadd.f32 %v151_v39, %v150_v32  ;;  %v159_v47 = vadd.f32 %v158_v40, %v157_v33  ;;  %v166_v48 = vadd.f32 %v165_v41, %v164_v34 }
  0x46   :  { %v173_v49 = vadd.f32 %v172_v42, %v171_v0  ;;  %v181_v50 = vcombine.low %v131_v43, %v138_v44  ;;  %v256_v5 = vsub.s32 3, %v560_v16  ;;  %v260_v6 = vsub.s32 4, %v560_v16 }
  0x47   :  { %v182_v51 = vcombine.low %v145_v45, %v152_v46  ;;  %v183_v52 = vcombine.low %v159_v47, %v166_v48  ;;  %v264_v9 = vsub.s32 5, %v560_v16  ;;  %v268_v14 = vsub.s32 6, %v560_v16 }
  0x48   :  { %v211_v53 = vrot.slane %v173_v49, %v189_v38  ;;  %v190_v54 = vrot.slane %v181_v50, %v189_v38  ;;  %v369_v50 = vstv %s368_s8 }
  0x49   :  { %v197_v55 = vrot.slane %v182_v51, %v189_v38  ;;  %v204_v56 = vrot.slane %v183_v52, %v189_v38  ;;  %v376_v51 = vstv %s375_s9  ;;  %v370_v52 = vmul.f32 1.442695, %v369_v50 }
  0x4b   :  { %v212_v57 = vcombine.low %v190_v54, %v197_v55  ;;  %v213_v58 = vcombine.low %v204_v56, %v211_v53  ;;  %v377_v53 = vmul.f32 1.442695, %v376_v51  ;;  %418 = vpow2.f32 %v370_v52 }
  0x4d   :  { %v220_v59 = vrot.slane %v212_v57, %v189_v38  ;;  %v227_v60 = vrot.slane %v213_v58, %v189_v38  ;;  %420 = vpow2.f32 %v377_v53 }
  0x4f   :  { %v228_v62 = vcombine.low %v220_v59, %v227_v60 }
  0x51   :  { %v230_v63 = vadd.f32 %v228_v62, %v110_v61 }
  0x53   :  { %235 = vst.msk [vmem:[#allocation2] sm:$0x7f] %vm553_vm0, %v230_v63 }
  0x5a   :  { %v239_v8 = vld [vmem:[#allocation2] sm:$0xff] }
  0x5b   :  { %v245_v10 = vrot.slane %v239_v8, %v244_v2  ;;  %v249_v11 = vrot.slane %v239_v8, %v248_v3  ;;  %v253_v12 = vrot.slane %v239_v8, %v252_v4  ;;  %v257_v1 = vrot.slane %v239_v8, %v256_v5 }
  0x5c   :  { %v261_v13 = vrot.slane %v239_v8, %v260_v6  ;;  %v300_v15 = vmul.f32 %v240_v7, %v239_v8  ;;  %v265_v20 = vrot.slane %v239_v8, %v264_v9  ;;  %v269_v27 = vrot.slane %v239_v8, %v268_v14 }
  0x5d   :  { %v278_v17 = vsel %vm277_vm1, %v245_v10, 0.0  ;;  %v279_v18 = vsel %vm277_vm1, %v249_v11, 0.0  ;;  %v281_v19 = vsel %vm277_vm1, %v253_v12, 0.0  ;;  %v283_v22 = vsel %vm277_vm1, %v257_v1, 0.0 }
  0x5e   :  { %v280_v21 = vadd.f32 %v279_v18, %v278_v17  ;;  %v305_v23 = vrot.slane %v300_v15, %v244_v2  ;;  %v309_v24 = vrot.slane %v300_v15, %v248_v3  ;;  %v313_v25 = vrot.slane %v300_v15, %v252_v4 }
  0x5f   :  { %v317_v26 = vrot.slane %v300_v15, %v256_v5  ;;  %v285_v29 = vsel %vm277_vm1, %v261_v13, 0.0  ;;  %v321_v16 = vrot.slane %v300_v15, %v260_v6  ;;  %v287_v0 = vsel %vm277_vm1, %v265_v20, 0.0  ;;  %v419_v5 = vpop.eup %418 }
  0x60   :  { %v282_v28 = vadd.f32 %v281_v19, %v280_v21  ;;  %v337_v30 = vsel %vm277_vm1, %v305_v23, 0.0  ;;  %v338_v31 = vsel %vm277_vm1, %v309_v24, 0.0  ;;  %v340_v32 = vsel %vm277_vm1, %v313_v25, 0.0  ;;  %v421_v7 = vpop.eup %420 }
  0x61   :  { %v339_v34 = vadd.f32 %v338_v31, %v337_v30  ;;  %v325_v35 = vrot.slane %v300_v15, %v264_v9  ;;  %v342_v36 = vsel %vm277_vm1, %v317_v26, 0.0  ;;  %v289_v39 = vsel %vm277_vm1, %v269_v27, 0.0 }
  0x62   :  { %v284_v33 = vadd.f32 %v283_v22, %v282_v28  ;;  %v329_v40 = vrot.slane %v300_v15, %v268_v14  ;;  %v344_v41 = vsel %vm277_vm1, %v321_v16, 0.0 }
  0x63   :  { %v341_v38 = vadd.f32 %v340_v32, %v339_v34  ;;  %v346_v44 = vsel %vm277_vm1, %v325_v35, 0.0 }
  0x64   :  { %v286_v37 = vadd.f32 %v285_v29, %v284_v33  ;;  %v348_v47 = vsel %vm277_vm1, %v329_v40, 0.0 }
  0x65   :  { %v343_v43 = vadd.f32 %v342_v36, %v341_v38 }
  0x66   :  { %v288_v42 = vadd.f32 %v287_v0, %v286_v37 }
  0x67   :  { %v345_v46 = vadd.f32 %v344_v41, %v343_v43 }
  0x68   :  { %v290_v45 = vadd.f32 %v289_v39, %v288_v42 }
  0x69   :  { %v347_v48 = vadd.f32 %v346_v44, %v345_v46 }
  0x6a   :  { %291 = vadd.xlane.f32.xlu0 %v290_v45 }
  0x6b   :  { %v349_v49 = vadd.f32 %v348_v47, %v347_v48 }
  0x6e   :  { %350 = vadd.xlane.f32.xlu0 %v349_v49 }
  0xf3   :  { %v292_v54 = vpop.xlane.xlu0 %291 }
  0xf4   :  { %v293_v55 = vrot.slane %v292_v54, 4 }
  0xf6   :  { %v294_v56 = vadd.f32 %v293_v55, %v292_v54 }
  0xf7   :  { %v351_v57 = vpop.xlane.xlu0 %350 }
  0xf8   :  { %v295_v58 = vrot.slane %v294_v56, 2  ;;  %v352_v59 = vrot.slane %v351_v57, 4 }
  0xfa   :  { %v353_v60 = vadd.f32 %v352_v59, %v351_v57  ;;  %v296_v61 = vadd.f32 %v295_v58, %v294_v56 }
  0xfc   :  { %v354_v62 = vrot.slane %v353_v60, 2  ;;  %v297_v63 = vrot.slane %v296_v61, 1 }
  0xfe   :  { %v355_v2 = vadd.f32 %v354_v62, %v353_v60  ;;  %v298_v3 = vadd.f32 %v297_v63, %v296_v61 }
 0x100   :  { %401 = vpush %v298_v3  ;;  %v356_v4 = vrot.slane %v355_v2, 1 }
 0x102   :  { %v357_v6 = vadd.f32 %v356_v4, %v355_v2 }
 0x104   :  { %403 = vpush %v357_v6 }
 0x105   :  { %405 = vpush %v419_v5 }
 0x106   :  { %407 = vpush %v421_v7 }
 0x131   :  { %s402_s10 = spop %401 }
 0x135   :  { %s404_s11 = spop %403 }
 0x136   :  { %s359_s12 = ssub.f32 %s402_s10, %s404_s11  ;;  %s362_s13 = smul.f32 0.041666668, %s404_s11 }
 0x137   :  { %s406_s14 = spop %405 }
 0x138   :  { %s365_s15 = smul.f32 0.03125, %s359_s12  ;;  %s408_s16 = spop %407 }
 0x139   :  { %s373_s17 = smul.f32 %s406_s14, %s362_s13 }
 0x13a   :  { %s380_s18 = smul.f32 %s408_s16, %s365_s15 }
 0x13b   :  { %s374_s19 = sadd.f32 %s373_s17, %s586_s1 }
 0x13d   :  { %s381_s20 = sadd.f32 %s380_s18, %s374_s19 }
 0x13f   :  { %s382_s21 = sadd.f32 %s588_s3, %s381_s20 }
 0x141   :  { %384 = sst [smem:[#allocation11]] %s382_s21 }
 0x142   :  { %392 = dma.smem_to_hbm %s514_s22, 16, %s601_s4, [#allocation7]  }
 0x143   :  { %504 = dma.done.wait [#allocation7], 16  }
 0x144   :  { %505 = vsyncadd [#allocation7], 4294967280 }
 0x145   :  { %396 = sfence }
 0x146   :  { %397 = vsyncpa [#allocation6], 1 }
 0x147   :  { %398 = vsyncpa [#allocation9], 1 }
 0x148   :  { %399 = vsyncpa [#allocation7], 1 }

</bundles_post_ra>
